<compile_context>
chip_gen: v6e
topology: v6e:2x2x1
jax: 0.10.0
libtpu: 0.0.40
codegen_flags: <defaults>
</compile_context>

<pallas_src>
import functools

import jax
import jax.numpy as jnp
from jax.experimental import pallas as pl
from jax.experimental.pallas import tpu as pltpu

LANES = 128   # lane width of a vreg (last-dim tiling unit)

# Fused single-call path is used when the whole padded problem fits VMEM comfortably.
_FUSED_MAX_NODES = 1024   # n_p <= 1024 -> A bf16 <= 2 MiB (+ small weights/acts)
_FUSED_MAX_FEAT = 512

# Tiled-path tiles (large-N fallback). 512-deep contraction fills the 256-wide MXUs
# of v6e/v7x; 512-row tiles amortize per-step overhead and cut A/X re-reads. Per-step
# footprint (double-buffered A/X/out + resident W + f32 acc) stays < 8 MiB at these
# sizes, under even v5e's 16 MiB scoped-VMEM default.
_TM = 512
_TK = 512


def _round_up(x, m):
    return ((x + m - 1) // m) * m


def _pad2d(x, rows, cols):
    r, c = x.shape
    return jnp.pad(x, ((0, rows - r), (0, cols - c)))


# ---------------------------------------------------------------------------
# Kernels
# ---------------------------------------------------------------------------
def _fused_forward_kernel(a_ref, x_ref, w1_ref, b1_ref, w2_ref, b2_ref, y_ref):
    """Whole 2-layer GCN forward in one program; all operands resident in VMEM.

      H = relu(A @ (X @ W1) + b1)
      Y = A @ (H @ W2) + b2

    bf16 MXU inputs, f32 accumulation / bias add / relu; intermediates never
    touch HBM.
    """
    a = a_ref[...]
    xw1 = jnp.dot(x_ref[...], w1_ref[...], preferred_element_type=jnp.float32)
    h = jnp.dot(a, xw1.astype(jnp.bfloat16), preferred_element_type=jnp.float32)
    h = jnp.maximum(h + b1_ref[...], 0.0).astype(jnp.bfloat16)
    # TODO(synk): for drop_prob > 0 in training, mask h here with
    # pltpu.prng_seed / pltpu.prng_random_bits; drop_prob = 0 -> identity.
    xw2 = jnp.dot(h, w2_ref[...], preferred_element_type=jnp.float32)
    y = jnp.dot(a, xw2.astype(jnp.bfloat16), preferred_element_type=jnp.float32)
    y_ref[...] = (y + b2_ref[...]).astype(y_ref.dtype)


def _gcn_layer_kernel(a_ref, x_ref, w_ref, b_ref, o_ref, acc_ref, *, apply_relu):
    """Tiled GCN layer: out[i] = act( sum_k A[i,k] @ (X[k] @ W) + b ).

    Feature transform is fused into the aggregation (W resident in VMEM, X[k] @ W
    recomputed per k-tile) so XW never round-trips through HBM. The f32 accumulator
    is initialized with the broadcast bias at k == 0.
    """
    k = pl.program_id(1)

    @pl.when(k == 0)
    def _():
        acc_ref[...] = jnp.broadcast_to(b_ref[...], acc_ref.shape)

    xw = jnp.dot(x_ref[...], w_ref[...], preferred_element_type=jnp.float32)
    acc_ref[...] += jnp.dot(
        a_ref[...], xw.astype(jnp.bfloat16), preferred_element_type=jnp.float32
    )

    @pl.when(k == pl.num_programs(1) - 1)
    def _():
        y = acc_ref[...]
        if apply_relu:
            y = jnp.maximum(y, 0.0)
        o_ref[...] = y.astype(o_ref.dtype)


def _gcn_layer_tiled(a_p, x_p, w_p, b_p, *, apply_relu, out_dtype, tm, tk):
    n_p = a_p.shape[0]
    f_in, f_out = w_p.shape
    return pl.pallas_call(
        functools.partial(_gcn_layer_kernel, apply_relu=apply_relu),
        out_shape=jax.ShapeDtypeStruct((n_p, f_out), out_dtype),
        grid=(n_p // tm, n_p // tk),
        in_specs=[
            pl.BlockSpec((tm, tk), lambda i, k: (i, k)),        # A row/col tile
            pl.BlockSpec((tk, f_in), lambda i, k: (k, 0)),      # X rows for this k
            pl.BlockSpec((f_in, f_out), lambda i, k: (0, 0)),   # W resident
            pl.BlockSpec((1, f_out), lambda i, k: (0, 0)),      # bias
        ],
        out_specs=pl.BlockSpec((tm, f_out), lambda i, k: (i, 0)),
        scratch_shapes=[pltpu.VMEM((tm, f_out), jnp.float32)],
        compiler_params=pltpu.CompilerParams(
            dimension_semantics=("parallel", "arbitrary")
        ),
    )(a_p, x_p, w_p, b_p)


# ---------------------------------------------------------------------------
# One-time preparation (hoisted out of the per-call forward)
# ---------------------------------------------------------------------------
def prepare_params(w1, b1, w2, b2):
    """Pre-transpose, lane-pad and bf16-cast the GCNConv parameters once."""
    in_dim, hidden_dim, out_dim = w1.shape[1], w1.shape[0], w2.shape[0]
    f_in = _round_up(in_dim, LANES)
    f_h = _round_up(hidden_dim, LANES)
    f_out = _round_up(out_dim, LANES)
    w1_p = _pad2d(w1.T, f_in, f_h).astype(jnp.bfloat16)    # (in, hidden): no in-kernel .T
    w2_p = _pad2d(w2.T, f_h, f_out).astype(jnp.bfloat16)   # (hidden, out)
    b1_p = _pad2d(b1.reshape(1, -1), 1, f_h).astype(jnp.float32)
    b2_p = _pad2d(b2.reshape(1, -1), 1, f_out).astype(jnp.float32)
    return w1_p, b1_p, w2_p, b2_p


def padded_num_nodes(n, f_in, f_h, f_out):
    """Pick the padded node count: lane-aligned for the fused path, tile-aligned otherwise."""
    n_128 = _round_up(n, LANES)
    if n_128 <= _FUSED_MAX_NODES and max(f_in, f_h, f_out) <= _FUSED_MAX_FEAT:
        return n_128
    return _round_up(n, max(_TM, _TK))


def prepare_adjacency(a_hat, *, n_pad):
    """One-time O(N^2) zero-pad + bf16 cast of the normalized adjacency."""
    return _pad2d(a_hat, n_pad, n_pad).astype(jnp.bfloat16)


# ---------------------------------------------------------------------------
# Full forward
# ---------------------------------------------------------------------------
@functools.partial(jax.jit, static_argnames=("out_dim",))
def gcn_forward(a_p, x, w1_p, b1_p, w2_p, b2_p, endmember_s, *, out_dim):
    """Y = A_hat @ relu(A_hat @ (X @ W1) + b1) @ W2 + b2 ; S = relu(endmemberS_00).

    Zero padding keeps the math exact: padded A columns are zero so padded rows of H
    (which equal relu(b1)) never contribute, padded feature lanes stay zero through
    both layers, and the result is sliced back at the end.
    """
    n = x.shape[0]
    n_p = a_p.shape[0]
    f_in, f_h = w1_p.shape
    f_out = w2_p.shape[1]

    # Per-call input prep: only X (the per-graph features) is padded/cast here.
    x_p = _pad2d(x, n_p, f_in).astype(jnp.bfloat16)

    fits_fused = (n_p <= _FUSED_MAX_NODES
                  and max(f_in, f_h, f_out) <= _FUSED_MAX_FEAT)

    if fits_fused:
        # Single pallas_call for the whole forward; everything resident in VMEM.
        y_p = pl.pallas_call(
            _fused_forward_kernel,
            out_shape=jax.ShapeDtypeStruct((n_p, f_out), jnp.float32),
            grid=(),
            in_specs=[
                pl.BlockSpec((n_p, n_p), lambda: (0, 0)),
                pl.BlockSpec((n_p, f_in), lambda: (0, 0)),
                pl.BlockSpec((f_in, f_h), lambda: (0, 0)),
                pl.BlockSpec((1, f_h), lambda: (0, 0)),
                pl.BlockSpec((f_h, f_out), lambda: (0, 0)),
                pl.BlockSpec((1, f_out), lambda: (0, 0)),
            ],
            out_specs=pl.BlockSpec((n_p, f_out), lambda: (0, 0)),
        )(a_p, x_p, w1_p, b1_p, w2_p, b2_p)
    else:
        # Large-N fallback: one tiled call per layer, feature transform fused into
        # the aggregation, row axis "parallel" (>= 3 row tiles here -> v7x megacore).
        tm = min(_TM, n_p)
        tk = min(_TK, n_p)
        h = _gcn_layer_tiled(a_p, x_p, w1_p, b1_p,
                             apply_relu=True, out_dtype=jnp.bfloat16, tm=tm, tk=tk)
        # TODO(synk): for drop_prob > 0 in training, mask h with a PRNG dropout kernel.
        y_p = _gcn_layer_tiled(a_p, h, w2_p, b2_p,
                               apply_relu=False, out_dtype=jnp.float32, tm=tm, tk=tk)

    y = y_p[:n, :out_dim]
    # relu(endmemberS_00): a dedicated kernel launch for a (1, num_features) relu is
    # pure overhead -> plain JAX (folded into the surrounding jit).
    s = jnp.maximum(endmember_s, 0.0)
    return y, s


# ---------------------------------------------------------------------------
# Glue: dense normalized adjacency (matches PyG gcn_norm, add_self_loops=True)
# ---------------------------------------------------------------------------
def build_norm_adj(edge_index, edge_weight, num_nodes):
    """Dense D^{-1/2}(A+I)D^{-1/2} with A_hat[dst, src] = norm."""
    # TODO(synk): for E << N^2, replace this dense scatter with a sparse
    # (segment-sum / scalar-prefetch row-gather) formulation.
    src = edge_index[0]
    dst = edge_index[1]
    loop = jnp.arange(num_nodes, dtype=src.dtype)
    src = jnp.concatenate([src, loop])
    dst = jnp.concatenate([dst, loop])
    w = jnp.concatenate([edge_weight, jnp.ones((num_nodes,), dtype=edge_weight.dtype)])

    deg = jnp.zeros((num_nodes,), dtype=jnp.float32).at[dst].add(w)
    dinv = jnp.where(deg > 0, jax.lax.rsqrt(deg), 0.0)
    norm = dinv[src] * w * dinv[dst]

    a_hat = jnp.zeros((num_nodes, num_nodes), dtype=jnp.float32).at[dst, src].add(norm)
    return a_hat


def init_params(key, in_dim, hidden_dim, out_dim, num_features):
    k1, k2, k3, k4, k5 = jax.random.split(key, 5)
    # GCNConv.lin weight is (out_channels, in_channels); bias is (out_channels,)
    w1 = jax.random.normal(k1, (hidden_dim, in_dim), jnp.float32) * (1.0 / jnp.sqrt(in_dim))
    b1 = jax.random.normal(k2, (hidden_dim,), jnp.float32) * 0.01
    w2 = jax.random.normal(k3, (out_dim, hidden_dim), jnp.float32) * (1.0 / jnp.sqrt(hidden_dim))
    b2 = jax.random.normal(k4, (out_dim,), jnp.float32) * 0.01
    # endmemberS_00 ~ torch.rand(1, num_features): uniform [0, 1)
    s = jax.random.uniform(k5, (1, num_features), jnp.float32)
    return w1, b1, w2, b2, s


if __name__ == "__main__":
    N = 16            # number of nodes
    E = 40            # number of (directed) edges
    IN_DIM = 8
    HIDDEN_DIM = 16
    OUT_DIM = 4
    NUM_FEATURES = 32

    key = jax.random.PRNGKey(0)
    kx, ke, kw, kp = jax.random.split(key, 4)

    # Node features (N, in_dim)
    x = jax.random.normal(kx, (N, IN_DIM), jnp.float32)

    # Random edge list (2, E) with positive edge weights
    edge_index = jax.random.randint(ke, (2, E), 0, N, dtype=jnp.int32)
    edge_weight = jax.random.uniform(kw, (E,), jnp.float32, minval=0.5, maxval=1.5)

    # Deterministic synthetic parameters
    w1, b1, w2, b2, endmember_s = init_params(kp, IN_DIM, HIDDEN_DIM, OUT_DIM, NUM_FEATURES)

    # Glue: dense normalized adjacency with self-loops
    a_hat = build_norm_adj(edge_index, edge_weight, N)

    # One-time prep (hoisted out of the per-forward path per review feedback)
    w1_p, b1_p, w2_p, b2_p = prepare_params(w1, b1, w2, b2)
    n_pad = padded_num_nodes(N, w1_p.shape[0], w1_p.shape[1], w2_p.shape[1])
    a_p = prepare_adjacency(a_hat, n_pad=n_pad)

    y, s = gcn_forward(a_p, x, w1_p, b1_p, w2_p, b2_p, endmember_s, out_dim=OUT_DIM)
    y = jax.block_until_ready(y)
    s = jax.block_until_ready(s)

    assert y.shape == (N, OUT_DIM) and y.dtype == jnp.float32
    assert s.shape == (1, NUM_FEATURES) and s.dtype == jnp.float32
    print("KERNEL_OK")
</pallas_src>

<mosaic_0001>
module attributes {stable_mosaic.version = 11 : i64} {
  func.func @_fused_forward_kernel(%arg0: memref<128x128xbf16, #tpu.memory_space<vmem>>, %arg1: memref<128x128xbf16, #tpu.memory_space<vmem>>, %arg2: memref<128x128xbf16, #tpu.memory_space<vmem>>, %arg3: memref<1x128xf32, #tpu.memory_space<vmem>>, %arg4: memref<128x128xbf16, #tpu.memory_space<vmem>>, %arg5: memref<1x128xf32, #tpu.memory_space<vmem>>, %arg6: memref<128x128xf32, #tpu.memory_space<vmem>>) attributes {dimension_semantics = [], scalar_prefetch = 0 : i64, scratch_operands = 0 : i64, tpu.core_type = #tpu.core_type<tc>} {
    %c0 = arith.constant 0 : index
    %c0_0 = arith.constant 0 : index
    %0 = vector.load %arg0[%c0, %c0_0] : memref<128x128xbf16, #tpu.memory_space<vmem>>, vector<128x128xbf16>
    %c0_1 = arith.constant 0 : index
    %c0_2 = arith.constant 0 : index
    %1 = vector.load %arg1[%c0_1, %c0_2] : memref<128x128xbf16, #tpu.memory_space<vmem>>, vector<128x128xbf16>
    %c0_3 = arith.constant 0 : index
    %c0_4 = arith.constant 0 : index
    %2 = vector.load %arg2[%c0_3, %c0_4] : memref<128x128xbf16, #tpu.memory_space<vmem>>, vector<128x128xbf16>
    %cst = arith.constant dense<0.000000e+00> : vector<128x128xf32>
    %3 = tpu.matmul %1, %2, %cst {dimension_numbers = #tpu.dot_dimension_numbers<[1], [0], [0], [1], [0, 0, 1, 1], [], []>} : vector<128x128xbf16>, vector<128x128xbf16>, vector<128x128xf32> -> vector<128x128xf32>
    %4 = arith.truncf %3 : vector<128x128xf32> to vector<128x128xbf16>
    %cst_5 = arith.constant dense<0.000000e+00> : vector<128x128xf32>
    %5 = tpu.matmul %0, %4, %cst_5 {dimension_numbers = #tpu.dot_dimension_numbers<[1], [0], [0], [1], [0, 0, 1, 1], [], []>} : vector<128x128xbf16>, vector<128x128xbf16>, vector<128x128xf32> -> vector<128x128xf32>
    %c0_6 = arith.constant 0 : index
    %c0_7 = arith.constant 0 : index
    %6 = vector.load %arg3[%c0_6, %c0_7] : memref<1x128xf32, #tpu.memory_space<vmem>>, vector<1x128xf32>
    %7 = vector.broadcast %6 : vector<1x128xf32> to vector<128x128xf32>
    %8 = arith.addf %5, %7 : vector<128x128xf32>
    %cst_8 = arith.constant 0.000000e+00 : f32
    %9 = vector.broadcast %cst_8 : f32 to vector<128x128xf32>
    %10 = arith.maximumf %8, %9 : vector<128x128xf32>
    %11 = arith.truncf %10 : vector<128x128xf32> to vector<128x128xbf16>
    %c0_9 = arith.constant 0 : index
    %c0_10 = arith.constant 0 : index
    %12 = vector.load %arg4[%c0_9, %c0_10] : memref<128x128xbf16, #tpu.memory_space<vmem>>, vector<128x128xbf16>
    %cst_11 = arith.constant dense<0.000000e+00> : vector<128x128xf32>
    %13 = tpu.matmul %11, %12, %cst_11 {dimension_numbers = #tpu.dot_dimension_numbers<[1], [0], [0], [1], [0, 0, 1, 1], [], []>} : vector<128x128xbf16>, vector<128x128xbf16>, vector<128x128xf32> -> vector<128x128xf32>
    %14 = arith.truncf %13 : vector<128x128xf32> to vector<128x128xbf16>
    %cst_12 = arith.constant dense<0.000000e+00> : vector<128x128xf32>
    %15 = tpu.matmul %0, %14, %cst_12 {dimension_numbers = #tpu.dot_dimension_numbers<[1], [0], [0], [1], [0, 0, 1, 1], [], []>} : vector<128x128xbf16>, vector<128x128xbf16>, vector<128x128xf32> -> vector<128x128xf32>
    %c0_13 = arith.constant 0 : index
    %c0_14 = arith.constant 0 : index
    %16 = vector.load %arg5[%c0_13, %c0_14] : memref<1x128xf32, #tpu.memory_space<vmem>>, vector<1x128xf32>
    %17 = vector.broadcast %16 : vector<1x128xf32> to vector<128x128xf32>
    %18 = arith.addf %15, %17 : vector<128x128xf32>
    %c0_15 = arith.constant 0 : index
    %c0_16 = arith.constant 0 : index
    %19 = vector.load %arg6[%c0_15, %c0_16] : memref<128x128xf32, #tpu.memory_space<vmem>>, vector<128x128xf32>
    tpu.vector_store %arg6[%c0_15, %c0_16], %18 {strides = array<i32>} : memref<128x128xf32, #tpu.memory_space<vmem>>, vector<128x128xf32>,
    return
  }
}

</mosaic_0001>

<bundles_post_ra>
// kernel: gcn_forward.1
= control target key start
LH: loop header
LB: loop body
LE: loop exit
PB: predicated region body
PF: predicated region fallthrough
CT: control target
= control target key end

     0   :  { %11 = vsyncpa [#allocation3], 0  ;;  %s1257_s0 = inlined_call_operand.vmem [shape: bf16[128,128], index: 0, kind: input, shape index: {}]   ;;  %s1258_s1 = inlined_call_operand.vmem [shape: bf16[128,128], index: 1, kind: input, shape index: {}]   ;;  %s1259_s2 = inlined_call_operand.hbm [shape: bf16[128,128], index: 2, kind: input, shape index: {}]   ;;  %s1260_s3 = inlined_call_operand.vmem [shape: f32[1,128], index: 3, kind: input, shape index: {}]   ;;  %s1261_s4 = inlined_call_operand.hbm [shape: bf16[128,128], index: 4, kind: input, shape index: {}]   ;;  %s1262_s5 = inlined_call_operand.vmem [shape: f32[1,128], index: 5, kind: input, shape index: {}]   ;;  %s1263_s6 = inlined_call_operand.vmem [shape: f32[128,128], index: 6, kind: output, shape index: {}]  }
   0x1   :  { %12 = vsyncpa [#allocation5], 0  ;;  %s1078_s21 = smov [#allocation2]  }
   0x2   :  { %s22_s22 = sshll.u32 %s1078_s21, 4  ;;  %s23_s22 = int_to_ptr.vmem [resolvable:$true] %s22_s22 }
   0x3   :  { %s1042_s23 = scalar_lea.vmem %s23_s22, 1024  ;;  %p1047_p1 = scmp.lt.s32.totalorder %s23_s22, %s23_s22 }
   0x4   :  { %p1043_p0 = scmp.ne.s32.totalorder %s23_s22, %s1042_s23  ;;  %p1048_p2 = scmp.lt.s32.totalorder %s1042_s23, %s1042_s23 }
   0x6   :  { %p1049_p3 = por %p1048_p2, %p1047_p1 }
   0x8   :  { %p1050_p4 = pnand %p1049_p3, %p1043_p0 }
   0xa   :  { %1053 = shalt.err (!%p1050_p4)
}
   0xb   :  { %s1079_s24 = smov 64   ;;  %s1080_s25 = smov 4  }
   0xc   :  { %28 = dma.hbm_to_vmem [thread:$0]  %s1259_s2, 1024, %s23_s22, [#allocation3], %s1079_s24, %s1079_s24, %s1080_s25  }
   0xd   :  { %s1081_s28 = smov [#allocation4]  }
   0xe   :  { %s36_s29 = sshll.u32 %s1081_s28, 4  ;;  %s37_s29 = int_to_ptr.vmem [resolvable:$true] %s36_s29 }
   0xf   :  { %s1062_s30 = scalar_lea.vmem %s37_s29, 1024  ;;  %p1067_p6 = scmp.lt.s32.totalorder %s37_s29, %s37_s29 }
  0x10   :  { %p1063_p5 = scmp.ne.s32.totalorder %s37_s29, %s1062_s30  ;;  %p1068_p7 = scmp.lt.s32.totalorder %s1062_s30, %s1062_s30 }
  0x12   :  { %p1069_p8 = por %p1068_p7, %p1067_p6 }
  0x14   :  { %p1070_p9 = pnand %p1069_p8, %p1063_p5 }
  0x16   :  { %1073 = shalt.err (!%p1070_p9)
}
  0x17   :  { %42 = dma.hbm_to_vmem [thread:$0]  %s1261_s4, 1024, %s37_s29, [#allocation5], %s1079_s24, %s1079_s24, %s1080_s25  }
  0x18   :  { %1074 = dma.done.wait [#allocation3], 1024  }
  0x19   :  { %1075 = vsyncadd [#allocation3], 4294966272 }
  0x1a   :  { %1076 = dma.done.wait [#allocation5], 1024  }
  0x1b   :  { %1077 = vsyncadd [#allocation5], 4294966272  ;;  %v1002_v0 = vld [vmem:[#allocation2 + $0x38] sm:$0xff]   ;;  %v1003_v1 = vld [vmem:[#allocation2 + $0x30] sm:$0xff]  }
  0x1c   :  { %870 = vmatprep.subr.bf16.mxu0 %v1002_v0  ;;  %v1004_v2 = vld [vmem:[#allocation2 + $0x28] sm:$0xff]   ;;  %v1005_v3 = vld [vmem:[#allocation2 + $0x20] sm:$0xff]   ;;  %v1006_v5 = vld [vmem:[#allocation2 + $0x18] sm:$0xff]  }
  0x1d   :  { %871 = vmatpush3.bf16.msra.mxu0 %v1002_v0  ;;  %v1010_v4 = vld [vmem:[%s1258_s1] sm:$0xff]   ;;  %v1007_v6 = vld [vmem:[#allocation2 + $0x10] sm:$0xff]   ;;  %v1008_v7 = vld [vmem:[#allocation2 + $0x8] sm:$0xff]  }
  0x1e   :  { %872 = vmatprep.subr.bf16.mxu0 %v1003_v1  ;;  %886 = vmatprep.mubr.bf16.mxu0 %v1010_v4  ;;  %v1009_v8 = vld [vmem:[#allocation2] sm:$0xff]   ;;  %v1011_v9 = vld [vmem:[%s1258_s1 + $0x8] sm:$0xff]   ;;  %v1012_v10 = vld [vmem:[%s1258_s1 + $0x10] sm:$0xff]  }
  0x1f   :  { %v1013_v11 = vld [vmem:[%s1258_s1 + $0x18] sm:$0xff]   ;;  %v1014_v12 = vld [vmem:[%s1258_s1 + $0x20] sm:$0xff]   ;;  %v1015_v13 = vld [vmem:[%s1258_s1 + $0x28] sm:$0xff]  }
  0x20   :  { %v1016_v14 = vld [vmem:[%s1258_s1 + $0x30] sm:$0xff]   ;;  %v1017_v15 = vld [vmem:[%s1258_s1 + $0x38] sm:$0xff]   ;;  %v1150_v16 = vld [vmem:[%s1257_s0] sm:$0xff]  }
  0x21   :  { %873 = vmatpush3.bf16.msra.mxu0 %v1003_v1  ;;  %918 = vmatprep.mubr.bf16.mxu1 %v1150_v16  ;;  %v1026_v17 = vld [vmem:[#allocation4 + $0x38] sm:$0xff]   ;;  %v1027_v18 = vld [vmem:[#allocation4 + $0x30] sm:$0xff]   ;;  %v1028_v19 = vld [vmem:[#allocation4 + $0x28] sm:$0xff]  }
  0x22   :  { %874 = vmatprep.subr.bf16.mxu0 %v1004_v2  ;;  %v1029_v20 = vld [vmem:[#allocation4 + $0x20] sm:$0xff]   ;;  %v1030_v21 = vld [vmem:[#allocation4 + $0x18] sm:$0xff]   ;;  %v1156_v46 = vld [vmem:[%s1257_s0 + $0x8] sm:$0xff]  }
  0x23   :  { %v1161_v47 = vld [vmem:[%s1257_s0 + $0x10] sm:$0xff]   ;;  %v1168_v48 = vld [vmem:[%s1257_s0 + $0x18] sm:$0xff]   ;;  %v1173_v49 = vld [vmem:[%s1257_s0 + $0x20] sm:$0xff]  }
  0x24   :  { %v1180_v50 = vld [vmem:[%s1257_s0 + $0x28] sm:$0xff]   ;;  %v1185_v51 = vld [vmem:[%s1257_s0 + $0x30] sm:$0xff]   ;;  %v1192_v52 = vld [vmem:[%s1257_s0 + $0x38] sm:$0xff]  }
  0x25   :  { %875 = vmatpush3.bf16.msra.mxu0 %v1004_v2  ;;  %v1031_v53 = vld [vmem:[#allocation4 + $0x10] sm:$0xff]   ;;  %v1032_v54 = vld [vmem:[#allocation4 + $0x8] sm:$0xff]   ;;  %v1033_v55 = vld [vmem:[#allocation4] sm:$0xff]  }
  0x26   :  { %876 = vmatprep.subr.bf16.mxu0 %v1005_v3  ;;  %v788_v58 = vld [vmem:[%s1260_s3] ss:$0 sm:$0xff] }
  0x29   :  { %877 = vmatpush3.bf16.msra.mxu0 %v1005_v3 }
  0x2a   :  { %878 = vmatprep.subr.bf16.mxu0 %v1006_v5 }
  0x2d   :  { %879 = vmatpush3.bf16.msra.mxu0 %v1006_v5 }
  0x2e   :  { %880 = vmatprep.subr.bf16.mxu0 %v1007_v6 }
  0x31   :  { %881 = vmatpush3.bf16.msra.mxu0 %v1007_v6 }
  0x32   :  { %882 = vmatprep.subr.bf16.mxu0 %v1008_v7 }
  0x35   :  { %883 = vmatpush3.bf16.msra.mxu0 %v1008_v7 }
  0x36   :  { %884 = vmatprep.subr.bf16.mxu0 %v1009_v8 }
  0x39   :  { %885 = vmatpush3.bf16.msra.mxu0 %v1009_v8 }
  0x3a   :  { %934 = vmatprep.subr.bf16.mxu0 %v1026_v17 }
  0x3c   :  { %887 = vmatmul.mubr.bf16.vlgmr.msra.gmra.mxu0 %v1011_v9 }
  0x3d   :  { %890 = vmatprep.mubr.bf16.mxu0 %v1012_v10  ;;  %935 = vmatpush3.bf16.msra.mxu0 %v1026_v17 }
  0x3e   :  { %936 = vmatprep.subr.bf16.mxu0 %v1027_v18 }
  0x41   :  { %937 = vmatpush3.bf16.msra.mxu0 %v1027_v18 }
  0x42   :  { %938 = vmatprep.subr.bf16.mxu0 %v1028_v19 }
  0x44   :  { %891 = vmatmul.mubr.bf16.gmra.mxu0 %v1013_v11 }
  0x45   :  { %894 = vmatprep.mubr.bf16.mxu0 %v1014_v12  ;;  %939 = vmatpush3.bf16.msra.mxu0 %v1028_v19 }
  0x46   :  { %940 = vmatprep.subr.bf16.mxu0 %v1029_v20 }
  0x49   :  { %941 = vmatpush3.bf16.msra.mxu0 %v1029_v20 }
  0x4a   :  { %942 = vmatprep.subr.bf16.mxu0 %v1030_v21 }
  0x4c   :  { %895 = vmatmul.mubr.bf16.gmra.mxu0 %v1015_v13 }
  0x4d   :  { %898 = vmatprep.mubr.bf16.mxu0 %v1016_v14  ;;  %943 = vmatpush3.bf16.msra.mxu0 %v1030_v21 }
  0x4e   :  { %944 = vmatprep.subr.bf16.mxu0 %v1031_v53 }
  0x51   :  { %945 = vmatpush3.bf16.msra.mxu0 %v1031_v53 }
  0x52   :  { %946 = vmatprep.subr.bf16.mxu0 %v1032_v54 }
  0x54   :  { %899 = vmatmul.mubr.bf16.gmra.mxu0 %v1017_v15 }
  0x55   :  { %947 = vmatpush3.bf16.msra.mxu0 %v1032_v54 }
  0x56   :  { %948 = vmatprep.subr.bf16.mxu0 %v1033_v55 }
  0x59   :  { %949 = vmatpush3.bf16.msra.mxu0 %v1033_v55 }
  0xfc   :  { %v888_v22 = vpop.f32.mrf.mxu0 }
  0xfe   :  { %v230_v23 = vpop.f32.mrf.mxu0 }
 0x100   :  { %v889_v24 = vpop.f32.mrf.mxu0 }
 0x101   :  { %v294_v44 = vpack.c.bf16 %v889_v24, %v888_v22 }
 0x102   :  { %v233_v25 = vpop.f32.mrf.mxu0 }
 0x103   :  { %v293_v45 = vpack.c.bf16 %v233_v25, %v230_v23 }
 0x104   :  { %v892_v26 = vpop.f32.mrf.mxu0 }
 0x106   :  { %v246_v27 = vpop.f32.mrf.mxu0 }
 0x108   :  { %v893_v28 = vpop.f32.mrf.mxu0 }
 0x109   :  { %v296_v42 = vpack.c.bf16 %v893_v28, %v892_v26 }
 0x10a   :  { %v249_v29 = vpop.f32.mrf.mxu0 }
 0x10b   :  { %v295_v43 = vpack.c.bf16 %v249_v29, %v246_v27 }
 0x10c   :  { %v896_v30 = vpop.f32.mrf.mxu0 }
 0x10e   :  { %v262_v31 = vpop.f32.mrf.mxu0 }
 0x110   :  { %v897_v32 = vpop.f32.mrf.mxu0 }
 0x111   :  { %v298_v40 = vpack.c.bf16 %v897_v32, %v896_v30 }
 0x112   :  { %v265_v33 = vpop.f32.mrf.mxu0 }
 0x113   :  { %v297_v41 = vpack.c.bf16 %v265_v33, %v262_v31 }
 0x114   :  { %v900_v34 = vpop.f32.mrf.mxu0 }
 0x116   :  { %v278_v35 = vpop.f32.mrf.mxu0 }
 0x118   :  { %v901_v36 = vpop.f32.mrf.mxu0 }
 0x119   :  { %v300_v37 = vpack.c.bf16 %v901_v36, %v900_v34 }
 0x11a   :  { %v281_v38 = vpop.f32.mrf.mxu0 }
 0x11b   :  { %v299_v39 = vpack.c.bf16 %v281_v38, %v278_v35  ;;  %902 = vmatprep.subr.bf16.mxu1 %v300_v37 }
 0x11c   :  { %903 = vmatpush3.bf16.msra.mxu1 %v300_v37 }
 0x11d   :  { %904 = vmatprep.subr.bf16.mxu1 %v299_v39 }
 0x120   :  { %905 = vmatpush3.bf16.msra.mxu1 %v299_v39 }
 0x121   :  { %906 = vmatprep.subr.bf16.mxu1 %v298_v40 }
 0x124   :  { %907 = vmatpush3.bf16.msra.mxu1 %v298_v40 }
 0x125   :  { %908 = vmatprep.subr.bf16.mxu1 %v297_v41 }
 0x128   :  { %909 = vmatpush3.bf16.msra.mxu1 %v297_v41 }
 0x129   :  { %910 = vmatprep.subr.bf16.mxu1 %v296_v42 }
 0x12c   :  { %911 = vmatpush3.bf16.msra.mxu1 %v296_v42 }
 0x12d   :  { %912 = vmatprep.subr.bf16.mxu1 %v295_v43 }
 0x130   :  { %913 = vmatpush3.bf16.msra.mxu1 %v295_v43 }
 0x131   :  { %914 = vmatprep.subr.bf16.mxu1 %v294_v44 }
 0x134   :  { %915 = vmatpush3.bf16.msra.mxu1 %v294_v44 }
 0x135   :  { %916 = vmatprep.subr.bf16.mxu1 %v293_v45 }
 0x138   :  { %917 = vmatpush3.bf16.msra.mxu1 %v293_v45 }
 0x13b   :  { %919 = vmatmul.mubr.bf16.vlgmr.msra.gmra.mxu1 %v1156_v46 }
 0x13c   :  { %922 = vmatprep.mubr.bf16.mxu1 %v1161_v47 }
 0x143   :  { %923 = vmatmul.mubr.bf16.gmra.mxu1 %v1168_v48 }
 0x144   :  { %926 = vmatprep.mubr.bf16.mxu1 %v1173_v49 }
 0x14b   :  { %927 = vmatmul.mubr.bf16.gmra.mxu1 %v1180_v50 }
 0x14c   :  { %930 = vmatprep.mubr.bf16.mxu1 %v1185_v51 }
 0x153   :  { %931 = vmatmul.mubr.bf16.gmra.mxu1 %v1192_v52 }
 0x154   :  { %982 = vmatprep.mubr.bf16.mxu1 %v1150_v16 }
 0x1fb   :  { %v920_v56 = vpop.f32.mrf.mxu1 }
 0x1fc   :  { %v399_v62 = vadd.f32 %v920_v56, %v788_v58 }
 0x1fd   :  { %v390_v57 = vpop.f32.mrf.mxu1 }
 0x1fe   :  { %v391_v60 = vadd.f32 %v788_v58, %v390_v57  ;;  %v455_v5 = vmax.f32 %v399_v62, 0.0 }
 0x1ff   :  { %v921_v59 = vpop.f32.mrf.mxu1 }
 0x200   :  { %v402_v61 = vadd.f32 %v921_v59, %v788_v58  ;;  %v453_v3 = vmax.f32 %v391_v60, 0.0 }
 0x201   :  { %v393_v63 = vpop.f32.mrf.mxu1 }
 0x202   :  { %v394_v0 = vadd.f32 %v788_v58, %v393_v63  ;;  %v456_v1 = vmax.f32 %v402_v61, 0.0 }
 0x203   :  { %v924_v2 = vpop.f32.mrf.mxu1 }
 0x204   :  { %v454_v4 = vmax.f32 %v394_v0, 0.0  ;;  %v470_v8 = vpack.c.bf16 %v456_v1, %v455_v5  ;;  %v415_v12 = vadd.f32 %v924_v2, %v788_v58 }
 0x205   :  { %v406_v6 = vpop.f32.mrf.mxu1 }
 0x206   :  { %v469_v7 = vpack.c.bf16 %v454_v4, %v453_v3  ;;  %v407_v10 = vadd.f32 %v788_v58, %v406_v6  ;;  %v459_v19 = vmax.f32 %v415_v12, 0.0 }
 0x207   :  { %v925_v9 = vpop.f32.mrf.mxu1 }
 0x208   :  { %v418_v11 = vadd.f32 %v925_v9, %v788_v58  ;;  %950 = vmatprep.mubr.bf16.mxu0 %v469_v7  ;;  %v457_v17 = vmax.f32 %v407_v10, 0.0 }
 0x209   :  { %v409_v13 = vpop.f32.mrf.mxu1  ;;  %951 = vmatmul.mubr.bf16.vlgmr.msra.gmra.mxu0 %v470_v8 }
 0x20a   :  { %v410_v14 = vadd.f32 %v788_v58, %v409_v13  ;;  %v460_v15 = vmax.f32 %v418_v11, 0.0 }
 0x20b   :  { %v928_v16 = vpop.f32.mrf.mxu1 }
 0x20c   :  { %v458_v18 = vmax.f32 %v410_v14, 0.0  ;;  %v472_v22 = vpack.c.bf16 %v460_v15, %v459_v19  ;;  %v431_v26 = vadd.f32 %v928_v16, %v788_v58  ;;  %v805_v16 = vld [vmem:[%s1262_s5] ss:$0 sm:$0xff] }
 0x20d   :  { %v422_v20 = vpop.f32.mrf.mxu1 }
 0x20e   :  { %v471_v21 = vpack.c.bf16 %v458_v18, %v457_v17  ;;  %v423_v24 = vadd.f32 %v788_v58, %v422_v20  ;;  %v463_v33 = vmax.f32 %v431_v26, 0.0 }
 0x20f   :  { %v929_v23 = vpop.f32.mrf.mxu1 }
 0x210   :  { %v434_v25 = vadd.f32 %v929_v23, %v788_v58  ;;  %954 = vmatprep.mubr.bf16.mxu0 %v471_v21  ;;  %v461_v31 = vmax.f32 %v423_v24, 0.0 }
 0x211   :  { %v425_v27 = vpop.f32.mrf.mxu1  ;;  %955 = vmatmul.mubr.bf16.gmra.mxu0 %v472_v22 }
 0x212   :  { %v426_v28 = vadd.f32 %v788_v58, %v425_v27  ;;  %v464_v29 = vmax.f32 %v434_v25, 0.0 }
 0x213   :  { %v932_v30 = vpop.f32.mrf.mxu1 }
 0x214   :  { %v462_v32 = vmax.f32 %v426_v28, 0.0  ;;  %v474_v36 = vpack.c.bf16 %v464_v29, %v463_v33  ;;  %v447_v40 = vadd.f32 %v932_v30, %v788_v58 }
 0x215   :  { %v438_v34 = vpop.f32.mrf.mxu1 }
 0x216   :  { %v473_v35 = vpack.c.bf16 %v462_v32, %v461_v31  ;;  %v439_v38 = vadd.f32 %v788_v58, %v438_v34  ;;  %v467_v53 = vmax.f32 %v447_v40, 0.0 }
 0x217   :  { %v933_v37 = vpop.f32.mrf.mxu1 }
 0x218   :  { %v450_v39 = vadd.f32 %v933_v37, %v788_v58  ;;  %958 = vmatprep.mubr.bf16.mxu0 %v473_v35  ;;  %v465_v44 = vmax.f32 %v439_v38, 0.0 }
 0x219   :  { %v441_v41 = vpop.f32.mrf.mxu1  ;;  %959 = vmatmul.mubr.bf16.gmra.mxu0 %v474_v36 }
 0x21a   :  { %v442_v42 = vadd.f32 %v788_v58, %v441_v41  ;;  %v468_v43 = vmax.f32 %v450_v39, 0.0 }
 0x21c   :  { %v466_v45 = vmax.f32 %v442_v42, 0.0  ;;  %v476_v55 = vpack.c.bf16 %v468_v43, %v467_v53 }
 0x21e   :  { %v475_v54 = vpack.c.bf16 %v466_v45, %v465_v44 }
 0x220   :  { %962 = vmatprep.mubr.bf16.mxu0 %v475_v54 }
 0x221   :  { %963 = vmatmul.mubr.bf16.gmra.mxu0 %v476_v55 }
 0x2c9   :  { %v952_v56 = vpop.f32.mrf.mxu0 }
 0x2cb   :  { %v575_v57 = vpop.f32.mrf.mxu0 }
 0x2cd   :  { %v953_v59 = vpop.f32.mrf.mxu0 }
 0x2ce   :  { %v639_v14 = vpack.c.bf16 %v953_v59, %v952_v56 }
 0x2cf   :  { %v578_v60 = vpop.f32.mrf.mxu0 }
 0x2d0   :  { %v638_v15 = vpack.c.bf16 %v578_v60, %v575_v57 }
 0x2d1   :  { %v956_v61 = vpop.f32.mrf.mxu0 }
 0x2d3   :  { %v591_v62 = vpop.f32.mrf.mxu0 }
 0x2d5   :  { %v957_v63 = vpop.f32.mrf.mxu0 }
 0x2d6   :  { %v641_v12 = vpack.c.bf16 %v957_v63, %v956_v61 }
 0x2d7   :  { %v594_v0 = vpop.f32.mrf.mxu0 }
 0x2d8   :  { %v640_v13 = vpack.c.bf16 %v594_v0, %v591_v62 }
 0x2d9   :  { %v960_v1 = vpop.f32.mrf.mxu0 }
 0x2db   :  { %v607_v2 = vpop.f32.mrf.mxu0 }
 0x2dd   :  { %v961_v3 = vpop.f32.mrf.mxu0 }
 0x2de   :  { %v643_v10 = vpack.c.bf16 %v961_v3, %v960_v1 }
 0x2df   :  { %v610_v58 = vpop.f32.mrf.mxu0 }
 0x2e0   :  { %v642_v11 = vpack.c.bf16 %v610_v58, %v607_v2 }
 0x2e1   :  { %v964_v4 = vpop.f32.mrf.mxu0 }
 0x2e3   :  { %v623_v5 = vpop.f32.mrf.mxu0 }
 0x2e5   :  { %v965_v6 = vpop.f32.mrf.mxu0 }
 0x2e6   :  { %v645_v7 = vpack.c.bf16 %v965_v6, %v964_v4 }
 0x2e7   :  { %v626_v8 = vpop.f32.mrf.mxu0 }
 0x2e8   :  { %v644_v9 = vpack.c.bf16 %v626_v8, %v623_v5  ;;  %966 = vmatprep.subr.bf16.mxu1 %v645_v7 }
 0x2e9   :  { %967 = vmatpush3.bf16.msra.mxu1 %v645_v7 }
 0x2ea   :  { %968 = vmatprep.subr.bf16.mxu1 %v644_v9 }
 0x2ed   :  { %969 = vmatpush3.bf16.msra.mxu1 %v644_v9 }
 0x2ee   :  { %970 = vmatprep.subr.bf16.mxu1 %v643_v10 }
 0x2f1   :  { %971 = vmatpush3.bf16.msra.mxu1 %v643_v10 }
 0x2f2   :  { %972 = vmatprep.subr.bf16.mxu1 %v642_v11 }
 0x2f5   :  { %973 = vmatpush3.bf16.msra.mxu1 %v642_v11 }
 0x2f6   :  { %974 = vmatprep.subr.bf16.mxu1 %v641_v12 }
 0x2f9   :  { %975 = vmatpush3.bf16.msra.mxu1 %v641_v12 }
 0x2fa   :  { %976 = vmatprep.subr.bf16.mxu1 %v640_v13 }
 0x2fd   :  { %977 = vmatpush3.bf16.msra.mxu1 %v640_v13 }
 0x2fe   :  { %978 = vmatprep.subr.bf16.mxu1 %v639_v14 }
 0x301   :  { %979 = vmatpush3.bf16.msra.mxu1 %v639_v14 }
 0x302   :  { %980 = vmatprep.subr.bf16.mxu1 %v638_v15 }
 0x305   :  { %981 = vmatpush3.bf16.msra.mxu1 %v638_v15 }
 0x308   :  { %983 = vmatmul.mubr.bf16.vlgmr.msra.gmra.mxu1 %v1156_v46 }
 0x309   :  { %986 = vmatprep.mubr.bf16.mxu1 %v1161_v47 }
 0x310   :  { %987 = vmatmul.mubr.bf16.gmra.mxu1 %v1168_v48 }
 0x311   :  { %990 = vmatprep.mubr.bf16.mxu1 %v1173_v49 }
 0x318   :  { %991 = vmatmul.mubr.bf16.gmra.mxu1 %v1180_v50 }
 0x319   :  { %994 = vmatprep.mubr.bf16.mxu1 %v1185_v51 }
 0x320   :  { %995 = vmatmul.mubr.bf16.gmra.mxu1 %v1192_v52 }
 0x3c8   :  { %v984_v17 = vpop.f32.mrf.mxu1 }
 0x3c9   :  { %v696_v18 = vadd.f32 %v984_v17, %v805_v16 }
 0x3ca   :  { %v687_v19 = vpop.f32.mrf.mxu1 }
 0x3cb   :  { %752 = vst [vmem:[%s1263_s6 + $0x10] sm:$0xff] %v696_v18  ;;  %v688_v46 = vadd.f32 %v805_v16, %v687_v19 }
 0x3cc   :  { %v985_v47 = vpop.f32.mrf.mxu1 }
 0x3cd   :  { %750 = vst [vmem:[%s1263_s6] sm:$0xff] %v688_v46  ;;  %v699_v48 = vadd.f32 %v985_v47, %v805_v16 }
 0x3ce   :  { %v690_v49 = vpop.f32.mrf.mxu1 }
 0x3cf   :  { %753 = vst [vmem:[%s1263_s6 + $0x18] sm:$0xff] %v699_v48  ;;  %v691_v50 = vadd.f32 %v805_v16, %v690_v49 }
 0x3d0   :  { %v988_v51 = vpop.f32.mrf.mxu1 }
 0x3d1   :  { %751 = vst [vmem:[%s1263_s6 + $0x8] sm:$0xff] %v691_v50  ;;  %v712_v52 = vadd.f32 %v988_v51, %v805_v16 }
 0x3d2   :  { %v703_v20 = vpop.f32.mrf.mxu1 }
 0x3d3   :  { %756 = vst [vmem:[%s1263_s6 + $0x30] sm:$0xff] %v712_v52  ;;  %v704_v21 = vadd.f32 %v805_v16, %v703_v20 }
 0x3d4   :  { %v989_v22 = vpop.f32.mrf.mxu1 }
 0x3d5   :  { %754 = vst [vmem:[%s1263_s6 + $0x20] sm:$0xff] %v704_v21  ;;  %v715_v23 = vadd.f32 %v989_v22, %v805_v16 }
 0x3d6   :  { %v706_v24 = vpop.f32.mrf.mxu1 }
 0x3d7   :  { %757 = vst [vmem:[%s1263_s6 + $0x38] sm:$0xff] %v715_v23  ;;  %v707_v25 = vadd.f32 %v805_v16, %v706_v24 }
 0x3d8   :  { %v992_v26 = vpop.f32.mrf.mxu1 }
 0x3d9   :  { %755 = vst [vmem:[%s1263_s6 + $0x28] sm:$0xff] %v707_v25  ;;  %v728_v27 = vadd.f32 %v992_v26, %v805_v16 }
 0x3da   :  { %v719_v28 = vpop.f32.mrf.mxu1 }
 0x3db   :  { %760 = vst [vmem:[%s1263_s6 + $0x50] sm:$0xff] %v728_v27  ;;  %v720_v29 = vadd.f32 %v805_v16, %v719_v28 }
 0x3dc   :  { %v993_v30 = vpop.f32.mrf.mxu1 }
 0x3dd   :  { %758 = vst [vmem:[%s1263_s6 + $0x40] sm:$0xff] %v720_v29  ;;  %v731_v31 = vadd.f32 %v993_v30, %v805_v16 }
 0x3de   :  { %v722_v32 = vpop.f32.mrf.mxu1 }
 0x3df   :  { %761 = vst [vmem:[%s1263_s6 + $0x58] sm:$0xff] %v731_v31  ;;  %v723_v33 = vadd.f32 %v805_v16, %v722_v32 }
 0x3e0   :  { %v996_v34 = vpop.f32.mrf.mxu1 }
 0x3e1   :  { %759 = vst [vmem:[%s1263_s6 + $0x48] sm:$0xff] %v723_v33  ;;  %v744_v35 = vadd.f32 %v996_v34, %v805_v16 }
 0x3e2   :  { %v735_v36 = vpop.f32.mrf.mxu1 }
 0x3e3   :  { %764 = vst [vmem:[%s1263_s6 + $0x70] sm:$0xff] %v744_v35  ;;  %v736_v37 = vadd.f32 %v805_v16, %v735_v36 }
 0x3e4   :  { %v997_v38 = vpop.f32.mrf.mxu1 }
 0x3e5   :  { %762 = vst [vmem:[%s1263_s6 + $0x60] sm:$0xff] %v736_v37  ;;  %v747_v39 = vadd.f32 %v997_v38, %v805_v16 }
 0x3e6   :  { %v738_v40 = vpop.f32.mrf.mxu1 }
 0x3e7   :  { %765 = vst [vmem:[%s1263_s6 + $0x78] sm:$0xff] %v747_v39  ;;  %v739_v41 = vadd.f32 %v805_v16, %v738_v40 }
 0x3e9   :  { %763 = vst [vmem:[%s1263_s6 + $0x68] sm:$0xff] %v739_v41 }
 0x3ea   :  { %770 = vsyncpa [#allocation3], 1 }
 0x3eb   :  { %771 = vsyncpa [#allocation5], 1 }

</bundles_post_ra>
